<compile_context>
chip_gen: v7x
topology: tpu7x:2x2x1
jax: 0.10.0
libtpu: 0.0.40
codegen_flags: <defaults>
</compile_context>

<pallas_src>
import functools
import math

import jax
import jax.numpy as jnp
from jax.experimental import pallas as pl
from jax.experimental.pallas import tpu as pltpu


# ------------------------------ tiling helper ------------------------------ #

def _pick_tile(dim, target, align):
    """Largest divisor of `dim` that is <= target and a multiple of `align`,
    falling back to the full dim (always legal: block == array extent)."""
    if dim <= target:
        return dim
    t = (target // align) * align
    while t >= align:
        if dim % t == 0:
            return t
        t -= align
    return dim


# --------------------------- gridded linear (GEMM) -------------------------- #

def _linear_kernel(x_ref, w_ref, o_ref, acc_ref):
    @pl.when(pl.program_id(2) == 0)
    def _():
        acc_ref[...] = jnp.zeros_like(acc_ref)
    acc_ref[...] += jnp.dot(x_ref[...].astype(jnp.bfloat16), w_ref[...],
                            preferred_element_type=jnp.float32)
    @pl.when(pl.program_id(2) == pl.num_programs(2) - 1)
    def _():
        o_ref[...] = acc_ref[...]


def _linear_bias_kernel(x_ref, w_ref, b_ref, o_ref, acc_ref):
    @pl.when(pl.program_id(2) == 0)
    def _():
        acc_ref[...] = jnp.zeros_like(acc_ref)
    acc_ref[...] += jnp.dot(x_ref[...].astype(jnp.bfloat16), w_ref[...],
                            preferred_element_type=jnp.float32)
    @pl.when(pl.program_id(2) == pl.num_programs(2) - 1)
    def _():
        o_ref[...] = acc_ref[...] + b_ref[...]


def linear(x2d, w_bf16, b=None):
    """y = x @ w (+ b).  x2d: (M, K) f32, w: (K, N) bf16, b: (N,) f32 -> (M, N) f32."""
    M, K = x2d.shape
    N = w_bf16.shape[1]
    tm = _pick_tile(M, 256, 8)
    tn = _pick_tile(N, 256, 128)
    tk = _pick_tile(K, 512, 128)
    grid = (M // tm, N // tn, K // tk)
    in_specs = [
        pl.BlockSpec((tm, tk), lambda i, j, k: (i, k)),
        pl.BlockSpec((tk, tn), lambda i, j, k: (k, j)),
    ]
    args = [x2d, w_bf16]
    if b is None:
        kern = _linear_kernel
    else:
        kern = _linear_bias_kernel
        in_specs.append(pl.BlockSpec((1, tn), lambda i, j, k: (0, j)))
        args.append(b.reshape(1, N))
    return pl.pallas_call(
        kern,
        grid=grid,
        in_specs=in_specs,
        out_specs=pl.BlockSpec((tm, tn), lambda i, j, k: (i, j)),
        out_shape=jax.ShapeDtypeStruct((M, N), jnp.float32),
        scratch_shapes=[pltpu.VMEM((tm, tn), jnp.float32)],
        compiler_params=pltpu.CompilerParams(
            dimension_semantics=("parallel", "parallel", "arbitrary")),
    )(*args)


# ------------------------- add + LayerNorm (fused) -------------------------- #

def _add_ln_kernel(x_ref, r_ref, g_ref, b_ref, o_ref):
    x = x_ref[...] + r_ref[...]
    mu = jnp.mean(x, axis=-1, keepdims=True)
    var = jnp.mean(jnp.square(x - mu), axis=-1, keepdims=True)
    o_ref[...] = (x - mu) * jax.lax.rsqrt(var + 1e-6) * g_ref[...] + b_ref[...]


def add_layernorm(x2d, res2d, gamma, beta):
    """LayerNorm(x + residual) over last dim, eps=1e-6 (matches nn.LayerNorm(eps=1e-06))."""
    M, D = x2d.shape
    tm = _pick_tile(M, 512, 8)
    return pl.pallas_call(
        _add_ln_kernel,
        grid=(M // tm,),
        in_specs=[
            pl.BlockSpec((tm, D), lambda i: (i, 0)),
            pl.BlockSpec((tm, D), lambda i: (i, 0)),
            pl.BlockSpec((1, D), lambda i: (0, 0)),
            pl.BlockSpec((1, D), lambda i: (0, 0)),
        ],
        out_specs=pl.BlockSpec((tm, D), lambda i: (i, 0)),
        out_shape=jax.ShapeDtypeStruct((M, D), jnp.float32),
        compiler_params=pltpu.CompilerParams(dimension_semantics=("parallel",)),
    )(x2d, res2d, gamma.reshape(1, D), beta.reshape(1, D))


# ----------------- output proj + residual + LayerNorm (fused) --------------- #

def _proj_res_ln_kernel(x_ref, w_ref, b_ref, r_ref, g_ref, bt_ref, o_ref):
    y = (jnp.dot(x_ref[...].astype(jnp.bfloat16), w_ref[...],
                 preferred_element_type=jnp.float32)
         + b_ref[...] + r_ref[...])
    mu = jnp.mean(y, axis=-1, keepdims=True)
    var = jnp.mean(jnp.square(y - mu), axis=-1, keepdims=True)
    o_ref[...] = (y - mu) * jax.lax.rsqrt(var + 1e-6) * g_ref[...] + bt_ref[...]


def proj_residual_layernorm(x2d, w_bf16, b, res2d, gamma, beta):
    M, K = x2d.shape
    D = w_bf16.shape[1]
    tm = _pick_tile(M, 256, 8)
    return pl.pallas_call(
        _proj_res_ln_kernel,
        grid=(M // tm,),
        in_specs=[
            pl.BlockSpec((tm, K), lambda i: (i, 0)),
            pl.BlockSpec((K, D), lambda i: (0, 0)),
            pl.BlockSpec((1, D), lambda i: (0, 0)),
            pl.BlockSpec((tm, D), lambda i: (i, 0)),
            pl.BlockSpec((1, D), lambda i: (0, 0)),
            pl.BlockSpec((1, D), lambda i: (0, 0)),
        ],
        out_specs=pl.BlockSpec((tm, D), lambda i: (i, 0)),
        out_shape=jax.ShapeDtypeStruct((M, D), jnp.float32),
        compiler_params=pltpu.CompilerParams(dimension_semantics=("parallel",)),
    )(x2d, w_bf16, b.reshape(1, D), res2d, gamma.reshape(1, D), beta.reshape(1, D))


# --------------------- FFN + residual + LayerNorm (fused) ------------------- #

def _ffn_kernel(x_ref, w1_ref, b1_ref, w2_ref, b2_ref, g_ref, bt_ref, o_ref):
    x = x_ref[...]
    h = (jnp.dot(x.astype(jnp.bfloat16), w1_ref[...],
                 preferred_element_type=jnp.float32) + b1_ref[...])
    h = jnp.maximum(h, 0.0)
    y = (jnp.dot(h.astype(jnp.bfloat16), w2_ref[...],
                 preferred_element_type=jnp.float32) + b2_ref[...] + x)
    mu = jnp.mean(y, axis=-1, keepdims=True)
    var = jnp.mean(jnp.square(y - mu), axis=-1, keepdims=True)
    o_ref[...] = (y - mu) * jax.lax.rsqrt(var + 1e-6) * g_ref[...] + bt_ref[...]


def ffn_residual_layernorm(x2d, w1, b1, w2, b2, gamma, beta):
    M, D = x2d.shape
    F = w1.shape[1]
    tm = _pick_tile(M, 256, 8)
    return pl.pallas_call(
        _ffn_kernel,
        grid=(M // tm,),
        in_specs=[
            pl.BlockSpec((tm, D), lambda i: (i, 0)),
            pl.BlockSpec((D, F), lambda i: (0, 0)),
            pl.BlockSpec((1, F), lambda i: (0, 0)),
            pl.BlockSpec((F, D), lambda i: (0, 0)),
            pl.BlockSpec((1, D), lambda i: (0, 0)),
            pl.BlockSpec((1, D), lambda i: (0, 0)),
            pl.BlockSpec((1, D), lambda i: (0, 0)),
        ],
        out_specs=pl.BlockSpec((tm, D), lambda i: (i, 0)),
        out_shape=jax.ShapeDtypeStruct((M, D), jnp.float32),
        compiler_params=pltpu.CompilerParams(dimension_semantics=("parallel",)),
    )(x2d, w1, b1.reshape(1, F), w2, b2.reshape(1, D),
      gamma.reshape(1, D), beta.reshape(1, D))


# ------------------------- multi-head attention core ------------------------ #

def _attn_core(q, k, v, mask, o_ref, *, n_head, d_k, d_v, scale):
    """q:(Lq,H*dk) k:(Lk,H*dk) v:(Lk,H*dv) mask:(Lq|1,Lk).  All heads, one call."""
    # additive bias computed once, shared across heads (broadcasts over Lq if mask is 1-row)
    bias = jnp.where(mask > 0, 0.0, -1e9)
    for h in range(n_head):
        qh = q[:, h * d_k:(h + 1) * d_k].astype(jnp.bfloat16)
        kh = k[:, h * d_k:(h + 1) * d_k].astype(jnp.bfloat16)
        vh = v[:, h * d_v:(h + 1) * d_v].astype(jnp.bfloat16)
        s = jax.lax.dot_general(qh, kh, (((1,), (1,)), ((), ())),
                                preferred_element_type=jnp.float32) * scale + bias
        s = s - jnp.max(s, axis=-1, keepdims=True)
        p = jnp.exp(s)
        inv_l = pl.reciprocal(jnp.sum(p, axis=-1, keepdims=True), approx=True)
        o_h = jnp.dot(p.astype(jnp.bfloat16), vh,
                      preferred_element_type=jnp.float32) * inv_l
        o_ref[:, h * d_v:(h + 1) * d_v] = o_h


def _self_attn_kernel(qkv_ref, m_ref, o_ref, *, n_head, d_k, d_v, scale):
    hk = n_head * d_k
    hv = n_head * d_v
    x = qkv_ref[...]                       # (Lq, 2*H*dk + H*dv) packed q|k|v
    q = x[:, :hk]
    k = x[:, hk:2 * hk]
    v = x[:, 2 * hk:2 * hk + hv]
    _attn_core(q, k, v, m_ref[...], o_ref,
               n_head=n_head, d_k=d_k, d_v=d_v, scale=scale)


def _cross_attn_kernel(q_ref, kv_ref, m_ref, o_ref, *, n_head, d_k, d_v, scale):
    hk = n_head * d_k
    kv = kv_ref[...]                       # (Lk, H*dk + H*dv) packed k|v
    k = kv[:, :hk]
    v = kv[:, hk:]
    _attn_core(q_ref[...], k, v, m_ref[...], o_ref,
               n_head=n_head, d_k=d_k, d_v=d_v, scale=scale)


def self_attention(qkv, mask, n_head, d_k, d_v):
    """qkv:(B,Lq,2*H*dk+H*dv)  mask:(B,Lq,Lq) -> (B,Lq,H*dv).  Grid over batch only."""
    B, Lq, Dp = qkv.shape
    Do = n_head * d_v
    kern = functools.partial(_self_attn_kernel, n_head=n_head, d_k=d_k, d_v=d_v,
                             scale=1.0 / math.sqrt(d_k))
    return pl.pallas_call(
        kern,
        grid=(B,),
        in_specs=[
            pl.BlockSpec((None, Lq, Dp), lambda b: (b, 0, 0)),
            pl.BlockSpec((None, Lq, Lq), lambda b: (b, 0, 0)),
        ],
        out_specs=pl.BlockSpec((None, Lq, Do), lambda b: (b, 0, 0)),
        out_shape=jax.ShapeDtypeStruct((B, Lq, Do), jnp.float32),
        compiler_params=pltpu.CompilerParams(dimension_semantics=("parallel",)),
    )(qkv, mask)


def cross_attention(q, kv, mask, n_head, d_k, d_v):
    """q:(B,Lq,H*dk)  kv:(B,Lk,H*dk+H*dv)  mask:(B,1|Lq,Lk) -> (B,Lq,H*dv)."""
    B, Lq, Dq = q.shape
    Lk, Dkv = kv.shape[1], kv.shape[2]
    Lm = mask.shape[1]
    Do = n_head * d_v
    kern = functools.partial(_cross_attn_kernel, n_head=n_head, d_k=d_k, d_v=d_v,
                             scale=1.0 / math.sqrt(d_k))
    return pl.pallas_call(
        kern,
        grid=(B,),
        in_specs=[
            pl.BlockSpec((None, Lq, Dq), lambda b: (b, 0, 0)),
            pl.BlockSpec((None, Lk, Dkv), lambda b: (b, 0, 0)),
            pl.BlockSpec((None, Lm, Lk), lambda b: (b, 0, 0)),
        ],
        out_specs=pl.BlockSpec((None, Lq, Do), lambda b: (b, 0, 0)),
        out_shape=jax.ShapeDtypeStruct((B, Lq, Do), jnp.float32),
        compiler_params=pltpu.CompilerParams(dimension_semantics=("parallel",)),
    )(q, kv, mask)


# ------------------------------ model wrapper ------------------------------ #

def self_mha(x, mask, p, n_head, d_k, d_v):
    B, L, D = x.shape
    x2d = x.reshape(B * L, D)
    qkv2d = linear(x2d, p["w_qkv"], p["b_qkv"])          # fused Q|K|V projection
    o = self_attention(qkv2d.reshape(B, L, -1), mask, n_head, d_k, d_v)
    out2d = proj_residual_layernorm(o.reshape(B * L, n_head * d_v),
                                    p["wo"], p["bo"], x2d, p["ln_g"], p["ln_b"])
    return out2d.reshape(B, L, D)


def cross_mha(x_q, x_kv, mask, p, n_head, d_k, d_v):
    B, Lq, Dq = x_q.shape
    Lk, Dkv = x_kv.shape[1], x_kv.shape[2]
    xq2d = x_q.reshape(B * Lq, Dq)
    q2d = linear(xq2d, p["wq"], p["bq"])                 # Q projection
    kv2d = linear(x_kv.reshape(B * Lk, Dkv), p["w_kv"], p["b_kv"])  # fused K|V
    o = cross_attention(q2d.reshape(B, Lq, -1), kv2d.reshape(B, Lk, -1),
                        mask, n_head, d_k, d_v)
    out2d = proj_residual_layernorm(o.reshape(B * Lq, n_head * d_v),
                                    p["wo"], p["bo"], xq2d, p["ln_g"], p["ln_b"])
    return out2d.reshape(B, Lq, Dq)


def decoder_forward(params, x_seq, x_seq_mask, condition_seq, condition_seq_mask,
                    *, n_head, d_k, d_v):
    B, Lx = x_seq.shape
    D = params["emb"].shape[1]

    # Embedding lookup: plain-JAX gather (glue).  padding_idx row is zero.
    # TODO(synk): no clean Pallas gather for the embedding table; kept in JAX.
    emb = jnp.take(params["emb"], x_seq, axis=0)                     # (B, Lx, D)
    pos = jnp.broadcast_to(params["pos_table"][:Lx][None], (B, Lx, D))
    # dropout(p=0.1) is identity at inference time.
    dec = add_layernorm(emb.reshape(B * Lx, D), pos.reshape(B * Lx, D),
                        params["ln_g"], params["ln_b"]).reshape(B, Lx, D)

    x_mask = x_seq_mask.astype(jnp.float32)                          # (B, Lx, Lx)
    cond_mask = condition_seq_mask.astype(jnp.float32)               # (B, 1, Lc) compact

    for lp in params["layers"]:
        dec = self_mha(dec, x_mask, lp["slf"], n_head, d_k, d_v)
        dec = cross_mha(dec, condition_seq, cond_mask, lp["crs"], n_head, d_k, d_v)
        f = lp["ffn"]
        dec = ffn_residual_layernorm(dec.reshape(B * Lx, D), f["w1"], f["b1"],
                                     f["w2"], f["b2"], f["ln_g"], f["ln_b"]
                                     ).reshape(B, Lx, D)

    out = linear(dec.reshape(B * Lx, D), params["prj_w"])            # no bias
    return out.reshape(B, Lx, -1)


# ------------------------------ parameter init ----------------------------- #

def init_params(key, *, x_values_num, n_layers, head_num, dim_mid, dim_x,
                dim_condition, ff_hidden_dim, pad_idx, n_position):
    keys = iter(jax.random.split(key, 128))

    def dense(shape, scale=0.05):
        # weights stored in bf16 (MXU operand dtype); accumulation stays f32 in-kernel
        return (jax.random.normal(next(keys), shape, jnp.float32) * scale
                ).astype(jnp.bfloat16)

    emb = (jax.random.normal(next(keys), (x_values_num, dim_x), jnp.float32) * 0.1
           ).at[pad_idx].set(0.0)

    # Sinusoidal positional table (SettledPositionalEncoding).
    position = jnp.arange(n_position, dtype=jnp.float32)[:, None]
    i = jnp.arange(dim_x, dtype=jnp.float32)
    angle = position / jnp.power(10000.0, 2.0 * jnp.floor(i / 2.0) / dim_x)
    pos_table = jnp.where((jnp.arange(dim_x) % 2) == 0,
                          jnp.sin(angle), jnp.cos(angle)).astype(jnp.float32)

    hk = head_num * dim_mid     # d_k == d_v == dim_mid
    hv = head_num * dim_mid

    def self_attn_params(d_model):
        return dict(
            w_qkv=dense((d_model, 2 * hk + hv)),
            b_qkv=jnp.zeros((2 * hk + hv,), jnp.float32),
            wo=dense((hv, d_model)),
            bo=jnp.zeros((d_model,), jnp.float32),
            ln_g=jnp.ones((d_model,), jnp.float32),
            ln_b=jnp.zeros((d_model,), jnp.float32),
        )

    def cross_attn_params(d_model, d_cond):
        return dict(
            wq=dense((d_model, hk)),
            bq=jnp.zeros((hk,), jnp.float32),
            w_kv=dense((d_cond, hk + hv)),
            b_kv=jnp.zeros((hk + hv,), jnp.float32),
            wo=dense((hv, d_model)),
            bo=jnp.zeros((d_model,), jnp.float32),
            ln_g=jnp.ones((d_model,), jnp.float32),
            ln_b=jnp.zeros((d_model,), jnp.float32),
        )

    layers = []
    for _ in range(n_layers):
        layers.append(dict(
            slf=self_attn_params(dim_x),
            crs=cross_attn_params(dim_x, dim_condition),
            ffn=dict(
                w1=dense((dim_x, ff_hidden_dim)),
                b1=jnp.zeros((ff_hidden_dim,), jnp.float32),
                w2=dense((ff_hidden_dim, dim_x)),
                b2=jnp.zeros((dim_x,), jnp.float32),
                ln_g=jnp.ones((dim_x,), jnp.float32),
                ln_b=jnp.zeros((dim_x,), jnp.float32),
            ),
        ))

    return dict(
        emb=emb,
        pos_table=pos_table,
        ln_g=jnp.ones((dim_x,), jnp.float32),
        ln_b=jnp.zeros((dim_x,), jnp.float32),
        layers=layers,
        prj_w=dense((dim_x, x_values_num)),
    )


# ---------------------------------- main ----------------------------------- #

if __name__ == "__main__":
    B, Lx, Lc = 2, 8, 8
    x_values_num = 32
    n_layers = 2
    head_num = 2
    dim_mid = 16          # d_k = d_v
    dim_x = 32
    dim_condition = 32
    ff_hidden_dim = 64
    pad_idx = 0
    n_position = 200

    key = jax.random.PRNGKey(0)
    kp, kx, kc = jax.random.split(key, 3)

    params = init_params(kp, x_values_num=x_values_num, n_layers=n_layers,
                         head_num=head_num, dim_mid=dim_mid, dim_x=dim_x,
                         dim_condition=dim_condition, ff_hidden_dim=ff_hidden_dim,
                         pad_idx=pad_idx, n_position=n_position)

    x_seq = jax.random.randint(kx, (B, Lx), 1, x_values_num)
    x_seq = x_seq.at[:, -2:].set(pad_idx)                       # some padding
    condition_seq = jax.random.normal(kc, (B, Lc, dim_condition), jnp.float32)

    # pad mask (over keys) AND causal mask -> (B, Lx, Lx)
    pad_mask = (x_seq != pad_idx)[:, None, :]
    causal = jnp.tril(jnp.ones((Lx, Lx), dtype=bool))[None]
    x_seq_mask = (pad_mask & causal).astype(jnp.float32)
    condition_seq_mask = jnp.ones((B, 1, Lc), jnp.float32)      # compact (B, 1, Lc)

    out = decoder_forward(params, x_seq, x_seq_mask, condition_seq,
                          condition_seq_mask, n_head=head_num,
                          d_k=dim_mid, d_v=dim_mid)
    out = jax.block_until_ready(out)

    assert out.shape == (B, Lx, x_values_num), out.shape
    assert bool(jnp.all(jnp.isfinite(out)))
    print("KERNEL_OK")
</pallas_src>

<mosaic_0001>
module attributes {stable_mosaic.version = 11 : i64} {
  func.func @_add_ln_kernel(%arg0: i32, %arg1: memref<16x32xf32, #tpu.memory_space<vmem>>, %arg2: memref<16x32xf32, #tpu.memory_space<vmem>>, %arg3: memref<1x32xf32, #tpu.memory_space<vmem>>, %arg4: memref<1x32xf32, #tpu.memory_space<vmem>>, %arg5: memref<16x32xf32, #tpu.memory_space<vmem>>) attributes {dimension_semantics = [#tpu.dimension_semantics<parallel>], iteration_bounds = array<i64: 1>, scalar_prefetch = 0 : i64, scratch_operands = 0 : i64, tpu.core_type = #tpu.core_type<tc>, window_params = [{transform_indices = @transform_0, window_bounds = array<i64: 16, 32>}, {transform_indices = @transform_1, window_bounds = array<i64: 16, 32>}, {pipeline_mode = #tpu.pipeline_mode<synchronous>, transform_indices = @transform_2, window_bounds = array<i64: 1, 32>}, {pipeline_mode = #tpu.pipeline_mode<synchronous>, transform_indices = @transform_3, window_bounds = array<i64: 1, 32>}, {transform_indices = @transform_4, window_bounds = array<i64: 16, 32>}]} {
    %c0 = arith.constant 0 : index
    %c0_0 = arith.constant 0 : index
    %0 = vector.load %arg1[%c0, %c0_0] : memref<16x32xf32, #tpu.memory_space<vmem>>, vector<16x32xf32>
    %c0_1 = arith.constant 0 : index
    %c0_2 = arith.constant 0 : index
    %1 = vector.load %arg2[%c0_1, %c0_2] : memref<16x32xf32, #tpu.memory_space<vmem>>, vector<16x32xf32>
    %2 = arith.addf %0, %1 : vector<16x32xf32>
    %cst = arith.constant dense<0.000000e+00> : vector<16xf32>
    %3 = vector.multi_reduction <add>, %2, %cst [1] : vector<16x32xf32> to vector<16xf32>
    %4 = vector.shape_cast %3 : vector<16xf32> to vector<16x1xf32>
    %cst_3 = arith.constant 3.200000e+01 : f32
    %5 = vector.broadcast %cst_3 : f32 to vector<16x1xf32>
    %6 = arith.divf %4, %5 : vector<16x1xf32>
    %7 = vector.broadcast %6 : vector<16x1xf32> to vector<16x32xf32>
    %8 = arith.subf %2, %7 : vector<16x32xf32>
    %9 = arith.mulf %8, %8 : vector<16x32xf32>
    %cst_4 = arith.constant dense<0.000000e+00> : vector<16xf32>
    %10 = vector.multi_reduction <add>, %9, %cst_4 [1] : vector<16x32xf32> to vector<16xf32>
    %11 = vector.shape_cast %10 : vector<16xf32> to vector<16x1xf32>
    %cst_5 = arith.constant 3.200000e+01 : f32
    %12 = vector.broadcast %cst_5 : f32 to vector<16x1xf32>
    %13 = arith.divf %11, %12 : vector<16x1xf32>
    %14 = vector.broadcast %6 : vector<16x1xf32> to vector<16x32xf32>
    %15 = arith.subf %2, %14 : vector<16x32xf32>
    %cst_6 = arith.constant 9.99999997E-7 : f32
    %16 = vector.broadcast %cst_6 : f32 to vector<16x1xf32>
    %17 = arith.addf %13, %16 : vector<16x1xf32>
    %18 = math.rsqrt %17 : vector<16x1xf32>
    %19 = vector.broadcast %18 : vector<16x1xf32> to vector<16x32xf32>
    %20 = arith.mulf %15, %19 : vector<16x32xf32>
    %c0_7 = arith.constant 0 : index
    %c0_8 = arith.constant 0 : index
    %21 = vector.load %arg3[%c0_7, %c0_8] : memref<1x32xf32, #tpu.memory_space<vmem>>, vector<1x32xf32>
    %22 = vector.broadcast %21 : vector<1x32xf32> to vector<16x32xf32>
    %23 = arith.mulf %20, %22 : vector<16x32xf32>
    %c0_9 = arith.constant 0 : index
    %c0_10 = arith.constant 0 : index
    %24 = vector.load %arg4[%c0_9, %c0_10] : memref<1x32xf32, #tpu.memory_space<vmem>>, vector<1x32xf32>
    %25 = vector.broadcast %24 : vector<1x32xf32> to vector<16x32xf32>
    %26 = arith.addf %23, %25 : vector<16x32xf32>
    %c0_11 = arith.constant 0 : index
    %c0_12 = arith.constant 0 : index
    %27 = vector.load %arg5[%c0_11, %c0_12] : memref<16x32xf32, #tpu.memory_space<vmem>>, vector<16x32xf32>
    tpu.vector_store %arg5[%c0_11, %c0_12], %26 {strides = array<i32>} : memref<16x32xf32, #tpu.memory_space<vmem>>, vector<16x32xf32>,
    return
  }
  func.func @transform_0(%arg0: i32) -> (i32, i32) {
    %c0_i32 = arith.constant 0 : i32
    %c0_i32_0 = arith.constant 0 : i32
    return %arg0, %c0_i32 : i32, i32
  }
  func.func @transform_1(%arg0: i32) -> (i32, i32) {
    %c0_i32 = arith.constant 0 : i32
    %c0_i32_0 = arith.constant 0 : i32
    return %arg0, %c0_i32 : i32, i32
  }
  func.func @transform_2(%arg0: i32) -> (i32, i32) {
    %c0_i32 = arith.constant 0 : i32
    %c0_i32_0 = arith.constant 0 : i32
    %c0_i32_1 = arith.constant 0 : i32
    return %c0_i32, %c0_i32_0 : i32, i32
  }
  func.func @transform_3(%arg0: i32) -> (i32, i32) {
    %c0_i32 = arith.constant 0 : i32
    %c0_i32_0 = arith.constant 0 : i32
    %c0_i32_1 = arith.constant 0 : i32
    return %c0_i32, %c0_i32_0 : i32, i32
  }
  func.func @transform_4(%arg0: i32) -> (i32, i32) {
    %c0_i32 = arith.constant 0 : i32
    %c0_i32_0 = arith.constant 0 : i32
    return %arg0, %c0_i32 : i32, i32
  }
}

</mosaic_0001>

<bundles_post_ra>
// kernel: tpu_custom_call.1
= control target key start
LH: loop header
LB: loop body
LE: loop exit
PB: predicated region body
PF: predicated region fallthrough
CT: control target
= control target key end

     0   :  { %9 = vsyncpa [#allocation3], 0  ;;  %s288_s0 = inlined_call_operand.hbm [shape: f32[16,32], index: 0, kind: input, shape index: {}]   ;;  %s289_s1 = inlined_call_operand.hbm [shape: f32[16,32], index: 1, kind: input, shape index: {}]   ;;  %s290_s2 = inlined_call_operand.vmem [shape: f32[1,32], index: 2, kind: input, shape index: {}]   ;;  %s291_s3 = inlined_call_operand.vmem [shape: f32[1,32], index: 3, kind: input, shape index: {}]   ;;  %s292_s4 = inlined_call_operand.hbm [shape: f32[16,32], index: 4, kind: output, shape index: {}]  }
   0x1   :  { %10 = vsyncpa [#allocation6], 0 }
   0x2   :  { %11 = vsyncpa [#allocation4], 0  ;;  %s201_s15 = smov [#allocation2]   ;;  %s129_s19 = scalar_lea.hbm %s288_s0, 256 }
   0x3   :  { %s17_s16 = sshll.u32 %s201_s15, 4  ;;  %p130_p0 = scmp.ne.s32.totalorder %s288_s0, %s129_s19  ;;  %s18_s16 = int_to_ptr.vmem [resolvable:$true] %s17_s16 }
   0x4   :  { %p133_p1 = scmp.lt.u32.totalorder %s129_s19, %s288_s0 }
   0x6   :  { %p135_p2 = pnand %p133_p1, %p130_p0 }
   0x8   :  { %138 = shalt.err (!%p135_p2)
}
   0x9   :  { %s139_s24 = scalar_lea.vmem %s18_s16, 256  ;;  %p144_p4 = scmp.lt.s32.totalorder %s18_s16, %s18_s16 }
   0xa   :  { %p140_p3 = scmp.ne.s32.totalorder %s18_s16, %s139_s24  ;;  %p145_p5 = scmp.lt.s32.totalorder %s139_s24, %s139_s24 }
   0xc   :  { %p146_p6 = por %p145_p5, %p144_p4 }
   0xe   :  { %p147_p7 = pnand %p146_p6, %p140_p3 }
  0x10   :  { %150 = shalt.err (!%p147_p7)
}
  0x11   :  { %s202_s25 = smov 128   ;;  %s203_s26 = smov 8  }
  0x12   :  { %23 = dma.hbm_to_vmem [thread:$0]  %s288_s0, 256, %s18_s16, [#allocation3], %s202_s25, %s202_s25, %s203_s26  }
  0x13   :  { %s204_s29 = smov [#allocation5]   ;;  %s151_s7 = scalar_lea.hbm %s289_s1, 256 }
  0x14   :  { %s29_s30 = sshll.u32 %s204_s29, 4  ;;  %p152_p8 = scmp.ne.s32.totalorder %s289_s1, %s151_s7  ;;  %s30_s30 = int_to_ptr.vmem [resolvable:$true] %s29_s30 }
  0x15   :  { %p155_p9 = scmp.lt.u32.totalorder %s151_s7, %s289_s1 }
  0x17   :  { %p157_p10 = pnand %p155_p9, %p152_p8 }
  0x19   :  { %160 = shalt.err (!%p157_p10)
}
  0x1a   :  { %s161_s12 = scalar_lea.vmem %s30_s30, 256  ;;  %p166_p12 = scmp.lt.s32.totalorder %s30_s30, %s30_s30 }
  0x1b   :  { %p162_p11 = scmp.ne.s32.totalorder %s30_s30, %s161_s12  ;;  %p167_p13 = scmp.lt.s32.totalorder %s161_s12, %s161_s12 }
  0x1d   :  { %p168_p0 = por %p167_p13, %p166_p12 }
  0x1f   :  { %p169_p1 = pnand %p168_p0, %p162_p11 }
  0x21   :  { %172 = shalt.err (!%p169_p1)
}
  0x22   :  { %35 = dma.hbm_to_vmem [thread:$0]  %s289_s1, 256, %s30_s30, [#allocation6], %s202_s25, %s202_s25, %s203_s26  }
  0x23   :  { %195 = dma.done.wait [#allocation3], 256  }
  0x24   :  { %196 = vsyncadd [#allocation3], 4294967040 }
  0x25   :  { %197 = dma.done.wait [#allocation6], 256  }
  0x26   :  { %198 = vsyncadd [#allocation6], 4294967040  ;;  %v46_v0 = vld [vmem:[#allocation2] sm:$0xff]  ;;  %v48_v1 = vld [vmem:[#allocation5] sm:$0xff]  ;;  %vm52_vm0 = vcmask 261120   ;;  %s205_s17 = smov [#allocation7]  }
  0x27   :  { %v47_v2 = vld [vmem:[#allocation2 + $0x8] sm:$0xff]  ;;  %v50_v3 = vadd.f32 %v48_v1, %v46_v0  ;;  %v49_v4 = vld [vmem:[#allocation5 + $0x8] sm:$0xff]  ;;  %v118_v25 = vld [vmem:[%s290_s2] ss:$0 sm:$0xff]  ;;  %s105_s18 = sshll.u32 %s205_s17, 4  ;;  %s106_s18 = int_to_ptr.vmem [resolvable:$true] %s105_s18 }
  0x28   :  { %v51_v5 = vadd.f32 %v49_v4, %v47_v2  ;;  %v119_v27 = vld [vmem:[%s291_s3] ss:$0 sm:$0xff]  ;;  %s173_s19 = scalar_lea.vmem %s106_s18, 256  ;;  %p178_p3 = scmp.lt.s32.totalorder %s106_s18, %s106_s18 }
  0x29   :  { %v53_v6 = vsel %vm52_vm0, %v50_v3, 0.0  ;;  %p174_p2 = scmp.ne.s32.totalorder %s106_s18, %s173_s19  ;;  %p179_p4 = scmp.lt.s32.totalorder %s173_s19, %s173_s19 }
  0x2a   :  { %54 = vadd.xlane.f32.xlu0 %v53_v6  ;;  %v56_v7 = vsel %vm52_vm0, %v51_v5, 0.0 }
  0x2b   :  { %p180_p5 = por %p179_p4, %p178_p3 }
  0x2d   :  { %p181_p6 = pnand %p180_p5, %p174_p2 }
  0x2e   :  { %57 = vadd.xlane.f32.xlu0 %v56_v7 }
  0xb7   :  { %v55_v8 = vpop.xlane.xlu0 %54 }
  0xb8   :  { %v60_v9 = vmul.f32 0.03125, %v55_v8 }
  0xba   :  { %v62_v10 = vsub.f32 %v50_v3, %v60_v9 }
  0xbb   :  { %v58_v11 = vpop.xlane.xlu0 %57 }
  0xbc   :  { %v61_v12 = vmul.f32 0.03125, %v58_v11  ;;  %v64_v13 = vmul.f32 %v62_v10, %v62_v10 }
  0xbe   :  { %v63_v14 = vsub.f32 %v51_v5, %v61_v12  ;;  %v66_v15 = vsel %vm52_vm0, %v64_v13, 0.0 }
  0xbf   :  { %67 = vadd.xlane.f32.xlu1 %v66_v15 }
  0xc0   :  { %v65_v16 = vmul.f32 %v63_v14, %v63_v14 }
  0xc2   :  { %v69_v17 = vsel %vm52_vm0, %v65_v16, 0.0 }
  0xc3   :  { %70 = vadd.xlane.f32.xlu1 %v69_v17 }
 0x14c   :  { %v68_v18 = vpop.xlane.xlu1 %67 }
 0x14d   :  { %v72_v19 = vmul.f32 0.03125, %v68_v18 }
 0x14f   :  { %v74_v20 = vadd.f32 1e-06, %v72_v19 }
 0x150   :  { %v71_v21 = vpop.xlane.xlu1 %70 }
 0x151   :  { %125 = vrsqrt.f32 %v74_v20  ;;  %v73_v22 = vmul.f32 0.03125, %v71_v21 }
 0x153   :  { %v75_v23 = vadd.f32 1e-06, %v73_v22 }
 0x155   :  { %127 = vrsqrt.f32 %v75_v23 }
 0x15b   :  { %v126_v24 = vpop.eup %125 }
 0x15c   :  { %v78_v26 = vmul.f32 %v126_v24, %v62_v10 }
 0x15e   :  { %v87_v28 = vmul.f32 %v118_v25, %v78_v26 }
 0x15f   :  { %v128_v29 = vpop.eup %127 }
 0x160   :  { %v79_v30 = vmul.f32 %v128_v29, %v63_v14  ;;  %v96_v31 = vadd.f32 %v119_v27, %v87_v28 }
 0x162   :  { %v88_v32 = vmul.f32 %v118_v25, %v79_v30  ;;  %98 = vst.msk [vmem:[#allocation7] sm:$0xff] %vm52_vm0, %v96_v31 }
 0x164   :  { %v97_v33 = vadd.f32 %v119_v27, %v88_v32 }
 0x166   :  { %99 = vst.msk [vmem:[#allocation7 + $0x8] sm:$0xff] %vm52_vm0, %v97_v33 }
 0x167   :  { %184 = shalt.err (!%p181_p6)
}
 0x168   :  { %s185_s20 = scalar_lea.hbm %s292_s4, 256 }
 0x169   :  { %p186_p7 = scmp.ne.s32.totalorder %s292_s4, %s185_s20  ;;  %p189_p8 = scmp.lt.u32.totalorder %s185_s20, %s292_s4 }
 0x16b   :  { %p191_p9 = pnand %p189_p8, %p186_p7 }
 0x16d   :  { %194 = shalt.err (!%p191_p9)
}
 0x16e   :  { %111 = dma.vmem_to_hbm [thread:$0]  %s106_s18, 256, %s292_s4, [#allocation4], %s202_s25, %s202_s25, %s203_s26  }
 0x16f   :  { %199 = dma.done.wait [#allocation4], 256  }
 0x170   :  { %200 = vsyncadd [#allocation4], 4294967040 }
 0x171   :  { %115 = vsyncpa [#allocation3], 1 }
 0x172   :  { %116 = vsyncpa [#allocation6], 1 }
 0x173   :  { %117 = vsyncpa [#allocation4], 1 }

</bundles_post_ra>
